<compile_context>
chip_gen: v7x
topology: tpu7x:2x2x1
jax: 0.10.0
libtpu: 0.0.40
codegen_flags: <defaults>
</compile_context>

<pallas_src>
import math

import jax
import jax.numpy as jnp
from jax.experimental import pallas as pl
from jax.experimental.pallas import tpu as pltpu


def _router_kernel(x_ref, w1_ref, w2_ref, o_ref):
    # x_ref  : (tm, hidden)          VMEM, bf16
    # w1_ref : (hidden, width)       VMEM, bf16 (full, constant across grid)
    # w2_ref : (width, experts_pad)  VMEM, bf16 (full, constant across grid)
    # o_ref  : (tm, experts_pad)     VMEM, output dtype (lane-dense, 128-multiple)
    h = jnp.dot(x_ref[...], w1_ref[...], preferred_element_type=jnp.float32)
    h = jnp.tanh(h)                                    # hidden activation, kept in f32
    out = jnp.dot(h.astype(w2_ref.dtype), w2_ref[...],
                  preferred_element_type=jnp.float32)  # output_activation = identity
    o_ref[...] = out.astype(o_ref.dtype)


def _round_up(x, m):
    return ((x + m - 1) // m) * m


def moefication_router_forward(x, w1_t, w2_t, *, tm=1024, compute_dtype=jnp.bfloat16):
    """x: (..., hidden_dim). w1_t: (hidden, width). w2_t: (width, num_experts)."""
    orig_shape = x.shape
    hidden = orig_shape[-1]
    width = w1_t.shape[1]
    num_experts = w2_t.shape[1]

    x2d = x.reshape(-1, hidden)
    n_tok = x2d.shape[0]

    # Token tile: as large as possible (<= tm), multiple of 16 (bf16 sublane packing).
    tm_eff = min(tm, _round_up(n_tok, 16))
    n_pad = _round_up(n_tok, tm_eff)

    # Lane-pad experts to a multiple of 128 so output stores are unmasked / lane-dense.
    e_pad = _round_up(num_experts, 128)

    # Cast token-scaling input + weights to the MXU compute dtype (f32 accumulate in-kernel).
    x_p = x2d.astype(compute_dtype)
    if n_pad != n_tok:
        x_p = jnp.pad(x_p, ((0, n_pad - n_tok), (0, 0)))
    w1_c = w1_t.astype(compute_dtype)
    w2_c = w2_t.astype(compute_dtype)
    if e_pad != num_experts:
        w2_c = jnp.pad(w2_c, ((0, 0), (0, e_pad - num_experts)))

    out = pl.pallas_call(
        _router_kernel,
        out_shape=jax.ShapeDtypeStruct((n_pad, e_pad), x.dtype),
        grid_spec=pltpu.PrefetchScalarGridSpec(
            num_scalar_prefetch=0,
            grid=(n_pad // tm_eff,),
            in_specs=[
                pl.BlockSpec((tm_eff, hidden), lambda i: (i, 0)),
                # Constant block index -> Pallas keeps the weight tiles resident
                # across grid steps (no per-step re-DMA).
                pl.BlockSpec((hidden, width), lambda i: (0, 0)),
                pl.BlockSpec((width, e_pad), lambda i: (0, 0)),
            ],
            out_specs=pl.BlockSpec((tm_eff, e_pad), lambda i: (i, 0)),
        ),
        compiler_params=pltpu.CompilerParams(
            dimension_semantics=("parallel",)),  # shards token tiles across v7x's 2 TCs
    )(x_p, w1_c, w2_c)

    out = out[:n_tok, :num_experts]
    return out.reshape(*orig_shape[:-1], num_experts)


def _xavier_uniform(key, fan_out, fan_in, dtype=jnp.float32):
    # matches nn.init.xavier_uniform_ on an (out_features, in_features) weight
    bound = math.sqrt(6.0 / (fan_in + fan_out))
    return jax.random.uniform(key, (fan_out, fan_in), dtype=dtype,
                              minval=-bound, maxval=bound)


if __name__ == "__main__":
    # Module config (depth=2 default path): hidden_dim -> width -> num_experts
    hidden_dim, width, num_experts = 32, 128, 8
    batch, seq = 2, 8

    key = jax.random.PRNGKey(0)
    kx, k1, k2 = jax.random.split(key, 3)

    # PyTorch Linear weights are (out, in); activation='tanh' => xavier_uniform init,
    # bias=False so no bias terms.
    w1 = _xavier_uniform(k1, width, hidden_dim)        # (width, hidden)
    w2 = _xavier_uniform(k2, num_experts, width)       # (experts, width)
    # Pre-transpose for the kernel's [in, out] convention.
    w1_t = w1.T                                        # (hidden, width)
    w2_t = w2.T                                        # (width, experts)

    x = jax.random.normal(kx, (batch, seq, hidden_dim), dtype=jnp.float32)

    # TODO(synk): test_override_outputs_p (bernoulli override + response cache) is a
    # test-only stateful path; not implemented (default is None).

    out = moefication_router_forward(x, w1_t, w2_t)
    out = jax.block_until_ready(out)
    assert out.shape == (batch, seq, num_experts)

    # sanity check against a plain-JAX reference using the same bf16 compute precision
    x_bf = x.reshape(-1, hidden_dim).astype(jnp.bfloat16)
    h_ref = jnp.tanh(jnp.dot(x_bf, w1_t.astype(jnp.bfloat16),
                             preferred_element_type=jnp.float32))
    ref = jnp.dot(h_ref.astype(jnp.bfloat16), w2_t.astype(jnp.bfloat16),
                  preferred_element_type=jnp.float32).astype(x.dtype)
    ref = ref.reshape(batch, seq, num_experts)
    assert jnp.allclose(out, ref, atol=2e-2, rtol=2e-2)

    # looser check against the full-f32 reference (bf16 quantization error bound)
    ref_f32 = (jnp.tanh(x.reshape(-1, hidden_dim) @ w1_t) @ w2_t).reshape(batch, seq, num_experts)
    assert jnp.allclose(out, ref_f32, atol=6e-2, rtol=6e-2)

    print("KERNEL_OK")
</pallas_src>

<mosaic_0001>
module attributes {stable_mosaic.version = 11 : i64} {
  func.func @_router_kernel(%arg0: i32, %arg1: memref<16x32xbf16, #tpu.memory_space<vmem>>, %arg2: memref<32x128xbf16, #tpu.memory_space<vmem>>, %arg3: memref<128x128xbf16, #tpu.memory_space<vmem>>, %arg4: memref<16x128xf32, #tpu.memory_space<vmem>>) attributes {dimension_semantics = [#tpu.dimension_semantics<parallel>], iteration_bounds = array<i64: 1>, scalar_prefetch = 0 : i64, scratch_operands = 0 : i64, tpu.core_type = #tpu.core_type<tc>, window_params = [{transform_indices = @transform_0, window_bounds = array<i64: 16, 32>}, {pipeline_mode = #tpu.pipeline_mode<synchronous>, transform_indices = @transform_1, window_bounds = array<i64: 32, 128>}, {pipeline_mode = #tpu.pipeline_mode<synchronous>, transform_indices = @transform_2, window_bounds = array<i64: 128, 128>}, {transform_indices = @transform_3, window_bounds = array<i64: 16, 128>}]} {
    %c0 = arith.constant 0 : index
    %c0_0 = arith.constant 0 : index
    %0 = vector.load %arg1[%c0, %c0_0] : memref<16x32xbf16, #tpu.memory_space<vmem>>, vector<16x32xbf16>
    %c0_1 = arith.constant 0 : index
    %c0_2 = arith.constant 0 : index
    %1 = vector.load %arg2[%c0_1, %c0_2] : memref<32x128xbf16, #tpu.memory_space<vmem>>, vector<32x128xbf16>
    %cst = arith.constant dense<0.000000e+00> : vector<16x128xf32>
    %2 = tpu.matmul %0, %1, %cst {dimension_numbers = #tpu.dot_dimension_numbers<[1], [0], [0], [1], [0, 0, 1, 1], [], []>} : vector<16x32xbf16>, vector<32x128xbf16>, vector<16x128xf32> -> vector<16x128xf32>
    %3 = math.tanh %2 : vector<16x128xf32>
    %4 = arith.truncf %3 : vector<16x128xf32> to vector<16x128xbf16>
    %c0_3 = arith.constant 0 : index
    %c0_4 = arith.constant 0 : index
    %5 = vector.load %arg3[%c0_3, %c0_4] : memref<128x128xbf16, #tpu.memory_space<vmem>>, vector<128x128xbf16>
    %cst_5 = arith.constant dense<0.000000e+00> : vector<16x128xf32>
    %6 = tpu.matmul %4, %5, %cst_5 {dimension_numbers = #tpu.dot_dimension_numbers<[1], [0], [0], [1], [0, 0, 1, 1], [], []>} : vector<16x128xbf16>, vector<128x128xbf16>, vector<16x128xf32> -> vector<16x128xf32>
    %c0_6 = arith.constant 0 : index
    %c0_7 = arith.constant 0 : index
    %7 = vector.load %arg4[%c0_6, %c0_7] : memref<16x128xf32, #tpu.memory_space<vmem>>, vector<16x128xf32>
    tpu.vector_store %arg4[%c0_6, %c0_7], %6 {strides = array<i32>} : memref<16x128xf32, #tpu.memory_space<vmem>>, vector<16x128xf32>,
    return
  }
  func.func @transform_0(%arg0: i32) -> (i32, i32) {
    %c0_i32 = arith.constant 0 : i32
    %c0_i32_0 = arith.constant 0 : i32
    return %arg0, %c0_i32 : i32, i32
  }
  func.func @transform_1(%arg0: i32) -> (i32, i32) {
    %c0_i32 = arith.constant 0 : i32
    %c0_i32_0 = arith.constant 0 : i32
    %c0_i32_1 = arith.constant 0 : i32
    return %c0_i32, %c0_i32_0 : i32, i32
  }
  func.func @transform_2(%arg0: i32) -> (i32, i32) {
    %c0_i32 = arith.constant 0 : i32
    %c0_i32_0 = arith.constant 0 : i32
    %c0_i32_1 = arith.constant 0 : i32
    return %c0_i32, %c0_i32_0 : i32, i32
  }
  func.func @transform_3(%arg0: i32) -> (i32, i32) {
    %c0_i32 = arith.constant 0 : i32
    %c0_i32_0 = arith.constant 0 : i32
    return %arg0, %c0_i32 : i32, i32
  }
}

</mosaic_0001>

<bundles_post_ra>
// kernel: tpu_custom_call.1
= control target key start
LH: loop header
LB: loop body
LE: loop exit
PB: predicated region body
PF: predicated region fallthrough
CT: control target
= control target key end

     0   :  { %8 = vsyncpa [#allocation3], 0  ;;  %s518_s0 = inlined_call_operand.hbm [shape: bf16[16,32], index: 0, kind: input, shape index: {}]   ;;  %s519_s1 = inlined_call_operand.hbm [shape: bf16[32,128], index: 1, kind: input, shape index: {}]   ;;  %s520_s2 = inlined_call_operand.hbm [shape: bf16[128,128], index: 2, kind: input, shape index: {}]   ;;  %s521_s3 = inlined_call_operand.hbm [shape: f32[16,128], index: 3, kind: output, shape index: {}]  }
   0x1   :  { %9 = vsyncpa [#allocation6], 0 }
   0x2   :  { %10 = vsyncpa [#allocation4], 0  ;;  %s424_s12 = smov [#allocation5]   ;;  %s425_s14 = smov [#allocation2]  }
   0x3   :  { %s28_s13 = sshll.u32 %s424_s12, 4  ;;  %s16_s15 = sshll.u32 %s425_s14, 4  ;;  %s29_s13 = int_to_ptr.vmem [resolvable:$true] %s28_s13  ;;  %s454_s15 = int_to_ptr.vmem [resolvable:$true] %s16_s15 }
   0x4   :  { %s330_s18 = scalar_lea.hbm %s519_s1, 256 }
   0x5   :  { %p331_p0 = scmp.ne.s32.totalorder %s519_s1, %s330_s18  ;;  %p334_p1 = scmp.lt.u32.totalorder %s330_s18, %s519_s1 }
   0x7   :  { %p336_p2 = pnand %p334_p1, %p331_p0 }
   0x9   :  { %339 = shalt.err (!%p336_p2)
}
   0xa   :  { %s340_s23 = scalar_lea.vmem %s29_s13, 256  ;;  %p345_p4 = scmp.lt.s32.totalorder %s29_s13, %s29_s13 }
   0xb   :  { %p341_p3 = scmp.ne.s32.totalorder %s29_s13, %s340_s23  ;;  %p346_p5 = scmp.lt.s32.totalorder %s340_s23, %s340_s23 }
   0xd   :  { %p347_p6 = por %p346_p5, %p345_p4 }
   0xf   :  { %p348_p7 = pnand %p347_p6, %p341_p3 }
  0x11   :  { %351 = shalt.err (!%p348_p7)
}
  0x12   :  { %s426_s24 = smov 64   ;;  %s427_s25 = smov 4  }
  0x13   :  { %34 = dma.hbm_to_vmem [thread:$0]  %s519_s1, 256, %s29_s13, [#allocation6], %s426_s24, %s426_s24, %s427_s25  }
  0x14   :  { %s352_s30 = scalar_lea.hbm %s518_s0, 128 }
  0x15   :  { %p353_p8 = scmp.ne.s32.totalorder %s518_s0, %s352_s30  ;;  %p356_p9 = scmp.lt.u32.totalorder %s352_s30, %s518_s0 }
  0x17   :  { %p358_p10 = pnand %p356_p9, %p353_p8 }
  0x19   :  { %361 = shalt.err (!%p358_p10)
}
  0x1a   :  { %s362_s8 = scalar_lea.vmem %s454_s15, 128  ;;  %p367_p12 = scmp.lt.s32.totalorder %s454_s15, %s454_s15 }
  0x1b   :  { %p363_p11 = scmp.ne.s32.totalorder %s454_s15, %s362_s8  ;;  %p368_p13 = scmp.lt.s32.totalorder %s362_s8, %s362_s8 }
  0x1d   :  { %p369_p0 = por %p368_p13, %p367_p12 }
  0x1f   :  { %p370_p1 = pnand %p369_p0, %p363_p11 }
  0x21   :  { %373 = shalt.err (!%p370_p1)
}
  0x22   :  { %22 = dma.hbm_to_vmem [thread:$0]  %s518_s0, 128, %s454_s15, [#allocation3], %s426_s24, %s426_s24, %s427_s25  }
  0x23   :  { %s428_s10 = smov [#allocation7]   ;;  %s374_s14 = scalar_lea.hbm %s520_s2, 1024 }
  0x24   :  { %s40_s11 = sshll.u32 %s428_s10, 4  ;;  %p375_p2 = scmp.ne.s32.totalorder %s520_s2, %s374_s14  ;;  %s41_s11 = int_to_ptr.vmem [resolvable:$true] %s40_s11 }
  0x25   :  { %p378_p3 = scmp.lt.u32.totalorder %s374_s14, %s520_s2 }
  0x27   :  { %p380_p4 = pnand %p378_p3, %p375_p2 }
  0x29   :  { %383 = shalt.err (!%p380_p4)
}
  0x2a   :  { %s384_s20 = scalar_lea.vmem %s41_s11, 1024  ;;  %p389_p6 = scmp.lt.s32.totalorder %s41_s11, %s41_s11 }
  0x2b   :  { %p385_p5 = scmp.ne.s32.totalorder %s41_s11, %s384_s20  ;;  %p390_p7 = scmp.lt.s32.totalorder %s384_s20, %s384_s20 }
  0x2d   :  { %p391_p8 = por %p390_p7, %p389_p6 }
  0x2f   :  { %p392_p9 = pnand %p391_p8, %p385_p5 }
  0x31   :  { %395 = shalt.err (!%p392_p9)
}
  0x32   :  { %46 = dma.hbm_to_vmem [thread:$0]  %s520_s2, 1024, %s41_s11, [#allocation6], %s426_s24, %s426_s24, %s427_s25  }
  0x33   :  { %418 = dma.done.wait [#allocation3], 128  }
  0x34   :  { %419 = vsyncadd [#allocation3], 4294967168 }
  0x35   :  { %420 = dma.done.wait [#allocation6], 1280  }
  0x36   :  { %421 = vsyncadd [#allocation6], 4294966016  ;;  %v429_v0 = vmov 0.0   ;;  %vm430_vm0 = vmmov 0   ;;  %v315_v1 = vld [vmem:[#allocation5] sm:$0xff]   ;;  %v316_v2 = vld [vmem:[#allocation5 + $0x8] sm:$0xff]  }
  0x37   :  { %277 = vmatprep.subr.bf16.mxu0 %v429_v0  ;;  %281 = vmatprep.mubr.msk.bf16.mxu0 %vm430_vm0, %v429_v0  ;;  %v318_v3 = vld [vmem:[#allocation7] sm:$0xff]   ;;  %v317_v4 = vld [vmem:[#allocation2] sm:$0xff]   ;;  %vm80_vm1 = vcmask 261120   ;;  %v320_v6 = vld [vmem:[#allocation7 + $0x10] sm:$0xff]   ;;  %s431_s2 = smov [#allocation8]  }
  0x38   :  { %285 = vmatprep.subr.bf16.mxu1 %v429_v0  ;;  %301 = vmatprep.mubr.msk.bf16.mxu1 %vm430_vm0, %v429_v0  ;;  %v319_v5 = vld [vmem:[#allocation7 + $0x8] sm:$0xff]   ;;  %v321_v7 = vld [vmem:[#allocation7 + $0x18] sm:$0xff]   ;;  %v322_v8 = vld [vmem:[#allocation7 + $0x20] sm:$0xff]   ;;  %s240_s21 = sshll.u32 %s431_s2, 4  ;;  %s241_s21 = int_to_ptr.vmem [resolvable:$true] %s240_s21 }
  0x39   :  { %278 = vmatpush3.bf16.msra.mxu0 %v315_v1  ;;  %286 = vmatpush3.bf16.msra.mxu1 %v318_v3  ;;  %v323_v9 = vld [vmem:[#allocation7 + $0x28] sm:$0xff]   ;;  %v324_v10 = vld [vmem:[#allocation7 + $0x30] sm:$0xff]   ;;  %v325_v11 = vld [vmem:[#allocation7 + $0x38] sm:$0xff]   ;;  %s396_s22 = scalar_lea.vmem %s241_s21, 256  ;;  %p401_p11 = scmp.lt.s32.totalorder %s241_s21, %s241_s21 }
  0x3a   :  { %279 = vmatprep.subr.bf16.mxu0 %v429_v0  ;;  %287 = vmatprep.subr.bf16.mxu1 %v429_v0  ;;  %p397_p10 = scmp.ne.s32.totalorder %s241_s21, %s396_s22  ;;  %p402_p12 = scmp.lt.s32.totalorder %s396_s22, %s396_s22 }
  0x3c   :  { %p403_p13 = por %p402_p12, %p401_p11 }
  0x3d   :  { %280 = vmatpush3.bf16.msra.mxu0 %v316_v2  ;;  %288 = vmatpush3.bf16.msra.mxu1 %v319_v5 }
  0x3e   :  { %289 = vmatprep.subr.bf16.mxu1 %v429_v0  ;;  %p404_p0 = pnand %p403_p13, %p397_p10 }
  0x40   :  { %282 = vmatmul.mubr.msk.bf16.vlgmr.msra.gmra.mrb[0].mxu0 %vm80_vm1, %v317_v4 }
  0x41   :  { %290 = vmatpush3.bf16.msra.mxu1 %v320_v6 }
  0x42   :  { %291 = vmatprep.subr.bf16.mxu1 %v429_v0 }
  0x45   :  { %292 = vmatpush3.bf16.msra.mxu1 %v321_v7 }
  0x46   :  { %293 = vmatprep.subr.bf16.mxu1 %v429_v0 }
  0x49   :  { %294 = vmatpush3.bf16.msra.mxu1 %v322_v8 }
  0x4a   :  { %295 = vmatprep.subr.bf16.mxu1 %v429_v0 }
  0x4d   :  { %296 = vmatpush3.bf16.msra.mxu1 %v323_v9 }
  0x4e   :  { %297 = vmatprep.subr.bf16.mxu1 %v429_v0 }
  0x51   :  { %298 = vmatpush3.bf16.msra.mxu1 %v324_v10 }
  0x52   :  { %299 = vmatprep.subr.bf16.mxu1 %v429_v0 }
  0x55   :  { %300 = vmatpush3.bf16.msra.mxu1 %v325_v11 }
 0x113   :  { %v118_v12 = vpop.f32.mrb[0].mxu0 }
 0x114   :  { %v283_v13 = vpop.f32.mrb[1].mxu0  ;;  %326 = vtanh.f32 %v118_v12 }
 0x115   :  { %v121_v14 = vpop.f32.mrb[2].mxu0 }
 0x116   :  { %328 = vtanh.f32 %v121_v14  ;;  %v284_v15 = vpop.f32.mrb[3].mxu0 }
 0x11e   :  { %v327_v16 = vpop.eup %326 }
 0x120   :  { %v329_v17 = vpop.eup %328 }
 0x121   :  { %v127_v18 = vpack.c.bf16 %v329_v17, %v327_v16 }
 0x123   :  { %302 = vmatmul.mubr.bf16.vlgmr.msra.gmra.mrb[0].mxu1 %v127_v18 }
 0x1f6   :  { %v226_v19 = vpop.f32.mrb[0].mxu1 }
 0x1f7   :  { %233 = vst [vmem:[#allocation8] sm:$0xff] %v226_v19  ;;  %v303_v20 = vpop.f32.mrb[1].mxu1 }
 0x1f8   :  { %v229_v21 = vpop.f32.mrb[2].mxu1 }
 0x1f9   :  { %234 = vst [vmem:[#allocation8 + $0x8] sm:$0xff] %v229_v21  ;;  %v304_v22 = vpop.f32.mrb[3].mxu1 }
 0x1fa   :  { %407 = shalt.err (!%p404_p0)
}
 0x1fb   :  { %s408_s25 = scalar_lea.hbm %s521_s3, 256 }
 0x1fc   :  { %p409_p1 = scmp.ne.s32.totalorder %s521_s3, %s408_s25  ;;  %p412_p2 = scmp.lt.u32.totalorder %s408_s25, %s521_s3 }
 0x1fe   :  { %p414_p3 = pnand %p412_p2, %p409_p1 }
 0x200   :  { %417 = shalt.err (!%p414_p3)
}
 0x201   :  { %s432_s30 = smov 128   ;;  %s433_s4 = smov 8  }
 0x202   :  { %246 = dma.vmem_to_hbm [thread:$0]  %s241_s21, 256, %s521_s3, [#allocation4], %s432_s30, %s432_s30, %s433_s4  }
 0x203   :  { %422 = dma.done.wait [#allocation4], 256  }
 0x204   :  { %423 = vsyncadd [#allocation4], 4294967040 }
 0x205   :  { %250 = vsyncpa [#allocation3], 1 }
 0x206   :  { %251 = vsyncpa [#allocation6], 1 }
 0x207   :  { %252 = vsyncpa [#allocation4], 1 }

</bundles_post_ra>
